<compile_context>
chip_gen: v6e
topology: v6e:2x2x1
jax: 0.10.0
libtpu: 0.0.40
codegen_flags: <defaults>
</compile_context>

<pallas_src>
import functools
import math

import jax
import jax.numpy as jnp
from jax.experimental import pallas as pl
from jax.experimental.pallas import tpu as pltpu


_VMEM_LIMIT = 48 * 1024 * 1024   # headroom under v7x's 64 MiB physical VMEM
_GATE_BLOCK = 16                 # gate columns padded to an aligned block


# ---------------------------------------------------------------------------
# Chip-aware tile sizing
# ---------------------------------------------------------------------------
def _device_kind():
    try:
        return jax.devices()[0].device_kind.lower()
    except Exception:
        return ""


def _two_tensorcores():
    # v7x has 2 TensorCores per chip; v5e/v6e have 1.
    return "v7" in _device_kind()


def _default_tm_target():
    # Large tiles amortize the ~600-cycle per-grid-step overhead; v7x's
    # 3.2 TB/s HBM wants ~2048-row tiles, v5e/v6e are happy at 1024.
    return 2048 if _two_tensorcores() else 1024


def _sublane_multiple(dtype):
    # f32 -> 8, bf16 -> 16 (sublane packing).
    return max(8, 32 // jnp.dtype(dtype).itemsize)


def _choose_tm(n, dtype, target=None):
    """Token-tile size: big, sublane-aligned, balanced across TCs on v7x."""
    mult = _sublane_multiple(dtype)
    if target is None:
        target = _default_tm_target()
    target = max(mult, (int(target) // mult) * mult)
    if _two_tensorcores():
        # Keep >=2 balanced grid steps for small token counts so the
        # "parallel" axis can be sharded across both TensorCores.
        half = max(mult, pl.cdiv(pl.cdiv(n, 2), mult) * mult)
        target = min(target, half)
    n_cap = max(mult, pl.cdiv(n, mult) * mult)   # one block covers everything
    return min(target, n_cap)


# ---------------------------------------------------------------------------
# Pallas kernels
# ---------------------------------------------------------------------------
def _adapter_kernel(x_ref, w1_ref, b1_ref, w2_ref, b2_ref, o_ref):
    # x: (TM, D) in activation dtype; w1: (D, B); w2: (B, D); biases f32.
    x = x_ref[...]
    h = jnp.dot(x, w1_ref[...], preferred_element_type=jnp.float32) + b1_ref[...]
    h = jnp.maximum(h, 0.0)                                    # nn.ReLU()
    up = jnp.dot(h.astype(w2_ref.dtype), w2_ref[...],
                 preferred_element_type=jnp.float32) + b2_ref[...]
    o_ref[...] = (x.astype(jnp.float32) + up).astype(o_ref.dtype)   # residual


def _mec_kernel(x_ref, wdg_ref, bdg_ref, wup_ref, o_ref, *, bott):
    # x: (TM, D); wdg: (D, bott+3) = [wd | we/10]; bdg: (1, bott+3) f32;
    # wup: (3*bott+_GATE_BLOCK, D) = [wt; wv; wc; bt; bv; bc; 0].
    x = x_ref[...]

    # Fused down-projection + gating projection (temperature pre-folded).
    h = jnp.dot(x, wdg_ref[...], preferred_element_type=jnp.float32) + bdg_ref[...]
    down = jnp.maximum(h[:, :bott], 0.0)          # ReLU
    # TODO(synk): dropout with p>0 not implemented (module default p=0.0).
    logits = h[:, bott:bott + 3]

    # Expert gating softmax — exact divide for parity with the reference.
    m = jnp.max(logits, axis=-1, keepdims=True)
    e = jnp.exp(logits - m)
    g = e / jnp.sum(e, axis=-1, keepdims=True)

    # Fused expert up-projection: scale the narrow bottleneck activation by
    # each gate, append the gates (which pick up the gated biases) padded to a
    # lane-friendly block, and run ONE K=(3*bott+_GATE_BLOCK) matmul.
    rows = x.shape[0]
    g_block = jnp.concatenate(
        [g, jnp.zeros((rows, _GATE_BLOCK - 3), jnp.float32)], axis=-1)
    scaled = jnp.concatenate(
        [down * g[:, 0:1], down * g[:, 1:2], down * g[:, 2:3], g_block], axis=-1)
    up = jnp.dot(scaled.astype(wup_ref.dtype), wup_ref[...],
                 preferred_element_type=jnp.float32)

    o_ref[...] = (up + x.astype(jnp.float32)).astype(o_ref.dtype)   # residual


# ---------------------------------------------------------------------------
# Wrappers calling pallas_call
# ---------------------------------------------------------------------------
def adapter_forward(x, p, tm_target=None):
    B, S, D = x.shape
    N = B * S
    dtype = x.dtype
    bott = p["w1"].shape[1]
    tm = _choose_tm(N, dtype, tm_target)
    itemsize = jnp.dtype(dtype).itemsize

    xf = x.reshape(N, D)
    w1 = p["w1"].astype(dtype)
    w2 = p["w2"].astype(dtype)
    b1 = p["b1"].astype(jnp.float32)
    b2 = p["b2"].astype(jnp.float32)

    cost = pl.CostEstimate(
        flops=4 * N * D * bott,
        transcendentals=0,
        bytes_accessed=2 * N * D * itemsize + 2 * D * bott * itemsize
        + (bott + D) * 4)

    out = pl.pallas_call(
        _adapter_kernel,
        out_shape=jax.ShapeDtypeStruct((N, D), dtype),
        grid=(pl.cdiv(N, tm),),
        in_specs=[
            pl.BlockSpec((tm, D), lambda i: (i, 0)),
            pl.BlockSpec((D, bott), lambda i: (0, 0)),
            pl.BlockSpec((1, bott), lambda i: (0, 0)),
            pl.BlockSpec((bott, D), lambda i: (0, 0)),
            pl.BlockSpec((1, D), lambda i: (0, 0)),
        ],
        out_specs=pl.BlockSpec((tm, D), lambda i: (i, 0)),
        compiler_params=pltpu.CompilerParams(
            dimension_semantics=("parallel",),
            vmem_limit_bytes=_VMEM_LIMIT),
        cost_estimate=cost,
    )(xf, w1, b1, w2, b2)
    return out.reshape(B, S, D)


def mec_forward(x, p, tm_target=None):
    B, S, D = x.shape
    N = B * S
    dtype = x.dtype
    bott = p["wd"].shape[1]
    kup = 3 * bott + _GATE_BLOCK
    tm = _choose_tm(N, dtype, tm_target)
    itemsize = jnp.dtype(dtype).itemsize

    xf = x.reshape(N, D)
    wdg = p["wdg"].astype(dtype)
    bdg = p["bdg"].astype(jnp.float32)
    wup = p["wup"].astype(dtype)

    cost = pl.CostEstimate(
        flops=2 * N * D * (bott + 3) + 2 * N * kup * D,
        transcendentals=3 * N,
        bytes_accessed=2 * N * D * itemsize
        + (D * (bott + 3) + kup * D) * itemsize + (bott + 3) * 4)

    out = pl.pallas_call(
        functools.partial(_mec_kernel, bott=bott),
        out_shape=jax.ShapeDtypeStruct((N, D), dtype),
        grid=(pl.cdiv(N, tm),),
        in_specs=[
            pl.BlockSpec((tm, D), lambda i: (i, 0)),
            pl.BlockSpec((D, bott + 3), lambda i: (0, 0)),
            pl.BlockSpec((1, bott + 3), lambda i: (0, 0)),
            pl.BlockSpec((kup, D), lambda i: (0, 0)),
        ],
        out_specs=pl.BlockSpec((tm, D), lambda i: (i, 0)),
        compiler_params=pltpu.CompilerParams(
            dimension_semantics=("parallel",),
            vmem_limit_bytes=_VMEM_LIMIT),
        cost_estimate=cost,
    )(xf, wdg, bdg, wup)
    return out.reshape(B, S, D)


# ---------------------------------------------------------------------------
# Pure-JAX references (correctness check only, f32)
# ---------------------------------------------------------------------------
def adapter_ref(x, p):
    h = jnp.maximum(x @ p["w1"] + p["b1"][0], 0.0)
    return x + (h @ p["w2"] + p["b2"][0])


def mec_ref(x, p):
    w = jax.nn.softmax((x @ p["we"] + p["be"][0]) / 10.0, axis=-1)
    down = jnp.maximum(x @ p["wd"] + p["bd"][0], 0.0)
    up = ((down @ p["wt"] + p["bt"][0]) * w[..., 0:1]
          + (down @ p["wv"] + p["bv"][0]) * w[..., 1:2]
          + (down @ p["wc"] + p["bc"][0]) * w[..., 2:3])
    return up + x


# ---------------------------------------------------------------------------
# Parameter init (deterministic).  NOTE: the PyTorch module zero-inits the up
# projections (exact identity at init); here we use small deterministic
# uniform values so the kernel compute path is actually exercised.  Weights
# are stored (in, out), i.e. already transposed vs. torch.nn.Linear.weight.
# ---------------------------------------------------------------------------
def _unif(key, shape, fan_in):
    bound = 1.0 / math.sqrt(fan_in)
    return jax.random.uniform(key, shape, jnp.float32, -bound, bound)


def init_adapter(key, d_model, bottleneck):
    k1, k2, k3, k4 = jax.random.split(key, 4)
    return dict(
        w1=_unif(k1, (d_model, bottleneck), d_model),
        b1=_unif(k2, (1, bottleneck), d_model),
        w2=_unif(k3, (bottleneck, d_model), bottleneck),
        b2=_unif(k4, (1, d_model), bottleneck),
    )


def init_mec(key, d_model, bottleneck):
    ks = jax.random.split(key, 10)
    p = dict(
        wd=_unif(ks[0], (d_model, bottleneck), d_model),
        bd=_unif(ks[1], (1, bottleneck), d_model),
        wt=_unif(ks[2], (bottleneck, d_model), bottleneck),
        bt=_unif(ks[3], (1, d_model), bottleneck),
        wv=_unif(ks[4], (bottleneck, d_model), bottleneck),
        bv=_unif(ks[5], (1, d_model), bottleneck),
        wc=_unif(ks[6], (bottleneck, d_model), bottleneck),
        bc=_unif(ks[7], (1, d_model), bottleneck),
        we=_unif(ks[8], (d_model, 3), d_model),
        be=_unif(ks[9], (1, 3), d_model),
    )
    # Kernel-side derived params:
    #  * gating projection (with temperature t=10 folded in) fused into the
    #    down projection: wdg (D, bott+3), bdg (1, bott+3)
    #  * fused up-projection [wt; wv; wc; bt; bv; bc; 0] of shape (3B+16, D)
    p["wdg"] = jnp.concatenate([p["wd"], p["we"] / 10.0], axis=1)
    p["bdg"] = jnp.concatenate([p["bd"], p["be"] / 10.0], axis=1)
    p["wup"] = jnp.concatenate(
        [p["wt"], p["wv"], p["wc"], p["bt"], p["bv"], p["bc"],
         jnp.zeros((_GATE_BLOCK - 3, d_model), jnp.float32)], axis=0)
    return p


# ---------------------------------------------------------------------------
# Modex: mode-dispatch glue, matching the PyTorch hasattr() routing
# ---------------------------------------------------------------------------
class Modex:
    def __init__(self, d_model_visual=1024, d_model_textual=768,
                 bottleneck=16, dropout=0.0, layer_index=0, key=None):
        key = jax.random.PRNGKey(0) if key is None else key
        ks = jax.random.split(key, 8)
        self.layer_index = layer_index
        self.sub = {}   # name -> ("adapter"|"mec", params)
        if layer_index <= 11:
            self.sub["visual_msa"] = ("adapter", init_adapter(ks[0], d_model_visual, bottleneck))
            self.sub["visual_ffn"] = ("adapter", init_adapter(ks[1], d_model_visual, bottleneck))
            self.sub["textual_msa"] = ("adapter", init_adapter(ks[2], d_model_textual, bottleneck))
            if layer_index <= 5:
                self.sub["textual_ffn"] = ("adapter", init_adapter(ks[3], d_model_textual, bottleneck))
            else:
                self.sub["cross_msa"] = ("mec", init_mec(ks[4], d_model_textual, bottleneck))
                self.sub["cross_ffn"] = ("mec", init_mec(ks[5], d_model_textual, bottleneck))
        else:
            self.sub["textual_msa"] = ("adapter", init_adapter(ks[2], d_model_textual, bottleneck))
            self.sub["cross_msa"] = ("mec", init_mec(ks[4], d_model_textual, bottleneck))
            self.sub["cross_ffn"] = ("mec", init_mec(ks[5], d_model_textual, bottleneck))

    _MODE_TO_ATTR = {
        "text_msa": "textual_msa",
        "text_ffn": "textual_ffn",
        "cross_ffn": "cross_ffn",
        "visual_msa": "visual_msa",
        "visual_ffn": "visual_ffn",
        "cross_msa": "cross_msa",
        "decoder_ffn": "decoder_ffn",
        "decoder_cross_ffn": "decoder_cross_ffn",
        "decoder_msa": "decoder_msa",
        "decoder_cross_msa": "decoder_cross_msa",
    }

    def _lookup(self, mode):
        assert mode in self._MODE_TO_ATTR, mode
        return self.sub.get(self._MODE_TO_ATTR[mode], None)

    def forward(self, x, mode="text", layer=0, tm_target=None):
        entry = self._lookup(mode)
        if entry is None:
            return x
        kind, params = entry
        if kind == "adapter":
            return adapter_forward(x, params, tm_target)
        return mec_forward(x, params, tm_target)

    def reference(self, x, mode="text", layer=0):
        entry = self._lookup(mode)
        if entry is None:
            return x
        kind, params = entry
        return adapter_ref(x, params) if kind == "adapter" else mec_ref(x, params)


# ---------------------------------------------------------------------------
if __name__ == "__main__":
    # layer_index=6 instantiates both Adapter (visual/textual) and MEC (cross)
    # branches, exercising both kernels.
    model = Modex(d_model_visual=256, d_model_textual=128, bottleneck=16,
                  layer_index=6, key=jax.random.PRNGKey(0))

    kx, kv, kt = jax.random.split(jax.random.PRNGKey(0), 3)
    x_text = jax.random.normal(kx, (2, 8, 128), jnp.float32)    # (B, S, D_text)
    x_vis = jax.random.normal(kv, (2, 8, 256), jnp.float32)     # (B, S, D_vis)
    x_tail = jax.random.normal(kt, (2, 9, 128), jnp.float32)    # N=18, ragged

    cases = [
        # (mode, x, tm_target override)
        ("text_msa",   x_text, None),
        ("visual_msa", x_vis,  None),
        ("visual_ffn", x_vis,  None),
        ("cross_msa",  x_text, None),
        ("cross_ffn",  x_text, None),
        ("text_msa",   x_tail, 8),     # multi-step grid + masked partial block
        ("cross_ffn",  x_tail, 8),     # MEC partial-block path
        ("visual_ffn", x_vis.astype(jnp.bfloat16), None),    # bf16 adapter
        ("cross_msa",  x_text.astype(jnp.bfloat16), None),   # bf16 MEC
        ("text_ffn",   x_text, None),  # absent at layer_index=6 -> identity
    ]
    for mode, x, tm_t in cases:
        out = jax.block_until_ready(model.forward(x, mode=mode, tm_target=tm_t))
        assert out.shape == x.shape and out.dtype == x.dtype, mode
        ref = model.reference(x.astype(jnp.float32), mode=mode)
        tol = 5e-2 if x.dtype == jnp.bfloat16 else 5e-3
        assert jnp.allclose(out.astype(jnp.float32), ref, atol=tol, rtol=tol), mode

    print("KERNEL_OK")
</pallas_src>

<mosaic_0001>
module attributes {stable_mosaic.version = 11 : i64} {
  func.func @_adapter_kernel(%arg0: i32, %arg1: memref<16x128xf32, #tpu.memory_space<vmem>>, %arg2: memref<128x16xf32, #tpu.memory_space<vmem>>, %arg3: memref<1x16xf32, #tpu.memory_space<vmem>>, %arg4: memref<16x128xf32, #tpu.memory_space<vmem>>, %arg5: memref<1x128xf32, #tpu.memory_space<vmem>>, %arg6: memref<16x128xf32, #tpu.memory_space<vmem>>) attributes {dimension_semantics = [#tpu.dimension_semantics<parallel>], iteration_bounds = array<i64: 1>, scalar_prefetch = 0 : i64, scratch_operands = 0 : i64, tpu.core_type = #tpu.core_type<tc>, window_params = [{transform_indices = @transform_0, window_bounds = array<i64: 16, 128>}, {pipeline_mode = #tpu.pipeline_mode<synchronous>, transform_indices = @transform_1, window_bounds = array<i64: 128, 16>}, {pipeline_mode = #tpu.pipeline_mode<synchronous>, transform_indices = @transform_2, window_bounds = array<i64: 1, 16>}, {pipeline_mode = #tpu.pipeline_mode<synchronous>, transform_indices = @transform_3, window_bounds = array<i64: 16, 128>}, {pipeline_mode = #tpu.pipeline_mode<synchronous>, transform_indices = @transform_4, window_bounds = array<i64: 1, 128>}, {transform_indices = @transform_5, window_bounds = array<i64: 16, 128>}]} {
    %c0 = arith.constant 0 : index
    %c0_0 = arith.constant 0 : index
    %0 = vector.load %arg1[%c0, %c0_0] : memref<16x128xf32, #tpu.memory_space<vmem>>, vector<16x128xf32>
    %c0_1 = arith.constant 0 : index
    %c0_2 = arith.constant 0 : index
    %1 = vector.load %arg2[%c0_1, %c0_2] : memref<128x16xf32, #tpu.memory_space<vmem>>, vector<128x16xf32>
    %cst = arith.constant dense<0.000000e+00> : vector<16x16xf32>
    %2 = tpu.matmul %0, %1, %cst {dimension_numbers = #tpu.dot_dimension_numbers<[1], [0], [0], [1], [0, 0, 1, 1], [], []>} : vector<16x128xf32>, vector<128x16xf32>, vector<16x16xf32> -> vector<16x16xf32>
    %c0_3 = arith.constant 0 : index
    %c0_4 = arith.constant 0 : index
    %3 = vector.load %arg3[%c0_3, %c0_4] : memref<1x16xf32, #tpu.memory_space<vmem>>, vector<1x16xf32>
    %4 = vector.broadcast %3 : vector<1x16xf32> to vector<16x16xf32>
    %5 = arith.addf %2, %4 : vector<16x16xf32>
    %cst_5 = arith.constant 0.000000e+00 : f32
    %6 = vector.broadcast %cst_5 : f32 to vector<16x16xf32>
    %7 = arith.maximumf %5, %6 : vector<16x16xf32>
    %c0_6 = arith.constant 0 : index
    %c0_7 = arith.constant 0 : index
    %8 = vector.load %arg4[%c0_6, %c0_7] : memref<16x128xf32, #tpu.memory_space<vmem>>, vector<16x128xf32>
    %cst_8 = arith.constant dense<0.000000e+00> : vector<16x128xf32>
    %9 = tpu.matmul %7, %8, %cst_8 {dimension_numbers = #tpu.dot_dimension_numbers<[1], [0], [0], [1], [0, 0, 1, 1], [], []>} : vector<16x16xf32>, vector<16x128xf32>, vector<16x128xf32> -> vector<16x128xf32>
    %c0_9 = arith.constant 0 : index
    %c0_10 = arith.constant 0 : index
    %10 = vector.load %arg5[%c0_9, %c0_10] : memref<1x128xf32, #tpu.memory_space<vmem>>, vector<1x128xf32>
    %11 = vector.broadcast %10 : vector<1x128xf32> to vector<16x128xf32>
    %12 = arith.addf %9, %11 : vector<16x128xf32>
    %13 = arith.addf %0, %12 : vector<16x128xf32>
    %c0_11 = arith.constant 0 : index
    %c0_12 = arith.constant 0 : index
    %14 = vector.load %arg6[%c0_11, %c0_12] : memref<16x128xf32, #tpu.memory_space<vmem>>, vector<16x128xf32>
    tpu.vector_store %arg6[%c0_11, %c0_12], %13 {strides = array<i32>} : memref<16x128xf32, #tpu.memory_space<vmem>>, vector<16x128xf32>,
    return
  }
  func.func @transform_0(%arg0: i32) -> (i32, i32) {
    %c0_i32 = arith.constant 0 : i32
    %c0_i32_0 = arith.constant 0 : i32
    return %arg0, %c0_i32 : i32, i32
  }
  func.func @transform_1(%arg0: i32) -> (i32, i32) {
    %c0_i32 = arith.constant 0 : i32
    %c0_i32_0 = arith.constant 0 : i32
    %c0_i32_1 = arith.constant 0 : i32
    return %c0_i32, %c0_i32_0 : i32, i32
  }
  func.func @transform_2(%arg0: i32) -> (i32, i32) {
    %c0_i32 = arith.constant 0 : i32
    %c0_i32_0 = arith.constant 0 : i32
    %c0_i32_1 = arith.constant 0 : i32
    return %c0_i32, %c0_i32_0 : i32, i32
  }
  func.func @transform_3(%arg0: i32) -> (i32, i32) {
    %c0_i32 = arith.constant 0 : i32
    %c0_i32_0 = arith.constant 0 : i32
    %c0_i32_1 = arith.constant 0 : i32
    return %c0_i32, %c0_i32_0 : i32, i32
  }
  func.func @transform_4(%arg0: i32) -> (i32, i32) {
    %c0_i32 = arith.constant 0 : i32
    %c0_i32_0 = arith.constant 0 : i32
    %c0_i32_1 = arith.constant 0 : i32
    return %c0_i32, %c0_i32_0 : i32, i32
  }
  func.func @transform_5(%arg0: i32) -> (i32, i32) {
    %c0_i32 = arith.constant 0 : i32
    %c0_i32_0 = arith.constant 0 : i32
    return %arg0, %c0_i32 : i32, i32
  }
}

</mosaic_0001>

<bundles_post_ra>
// kernel: tpu_custom_call.1
= control target key start
LH: loop header
LB: loop body
LE: loop exit
PB: predicated region body
PF: predicated region fallthrough
CT: control target
= control target key end

     0   :  { %s433_s0 = inlined_call_operand.vmem [shape: f32[16,128], index: 0, kind: input, shape index: {}]   ;;  %s434_s1 = inlined_call_operand.vmem [shape: f32[128,16], index: 1, kind: input, shape index: {}]   ;;  %s435_s2 = inlined_call_operand.vmem [shape: f32[1,16], index: 2, kind: input, shape index: {}]   ;;  %s436_s3 = inlined_call_operand.vmem [shape: f32[16,128], index: 3, kind: input, shape index: {}]   ;;  %s437_s4 = inlined_call_operand.vmem [shape: f32[1,128], index: 4, kind: input, shape index: {}]   ;;  %s438_s5 = inlined_call_operand.hbm [shape: f32[16,128], index: 5, kind: output, shape index: {}]  }
   0x1   :  { %v38_v0 = vld [vmem:[%s434_s1 + $0x78] sm:$0xff]  ;;  %v37_v1 = vld [vmem:[%s434_s1 + $0x70] sm:$0xff]  ;;  %v36_v2 = vld [vmem:[%s434_s1 + $0x68] sm:$0xff] }
   0x2   :  { %260 = vmatprep.subr.mxu0 %v38_v0  ;;  %v35_v3 = vld [vmem:[%s434_s1 + $0x60] sm:$0xff]  ;;  %v34_v5 = vld [vmem:[%s434_s1 + $0x58] sm:$0xff] }
   0x3   :  { %261 = vmatpush3.msra.mxu0 %v38_v0  ;;  %v375_v4 = vld [vmem:[%s433_s0] sm:$0xff] }
   0x4   :  { %262 = vmatprep.subr.mxu0 %v37_v1  ;;  %292 = vmatprep.mubr.f32.mxu0 %v375_v4 }
   0x5   :  { %263 = vmatpush3.msra.mxu0 %v37_v1 }
   0x6   :  { %264 = vmatprep.subr.mxu0 %v36_v2 }
   0x7   :  { %265 = vmatpush3.msra.mxu0 %v36_v2 }
   0x8   :  { %10 = vsyncpa [#allocation3], 0  ;;  %266 = vmatprep.subr.mxu0 %v35_v3  ;;  %v33_v6 = vld [vmem:[%s434_s1 + $0x50] sm:$0xff]  ;;  %v32_v7 = vld [vmem:[%s434_s1 + $0x48] sm:$0xff]  ;;  %vm132_vm0 = vcmask 130048  }
   0x9   :  { %267 = vmatpush3.msra.mxu0 %v35_v3  ;;  %v31_v8 = vld [vmem:[%s434_s1 + $0x40] sm:$0xff]  ;;  %v30_v9 = vld [vmem:[%s434_s1 + $0x38] sm:$0xff]  ;;  %v29_v10 = vld [vmem:[%s434_s1 + $0x30] sm:$0xff] }
   0xa   :  { %268 = vmatprep.subr.mxu0 %v34_v5  ;;  %v28_v11 = vld [vmem:[%s434_s1 + $0x28] sm:$0xff]  ;;  %v27_v12 = vld [vmem:[%s434_s1 + $0x20] sm:$0xff]  ;;  %v26_v13 = vld [vmem:[%s434_s1 + $0x18] sm:$0xff] }
   0xb   :  { %269 = vmatpush3.msra.mxu0 %v34_v5  ;;  %v25_v14 = vld [vmem:[%s434_s1 + $0x10] sm:$0xff]  ;;  %v24_v15 = vld [vmem:[%s434_s1 + $0x8] sm:$0xff]  ;;  %v23_v16 = vld [vmem:[%s434_s1] sm:$0xff] }
   0xc   :  { %270 = vmatprep.subr.mxu0 %v33_v6  ;;  %v22_v17 = vld [vmem:[%s433_s0 + $0x8] sm:$0xff]  ;;  %v123_v19 = vld [vmem:[%s436_s3] sm:$0xff] }
   0xd   :  { %271 = vmatpush3.msra.mxu0 %v33_v6  ;;  %v124_v18 = vld [vmem:[%s436_s3 + $0x8] sm:$0xff]  ;;  %v234_v20 = vld [vmem:[%s435_s2] ss:$0 sm:$0xff]  ;;  %s327_s3 = smov [#allocation2]  }
   0xe   :  { %272 = vmatprep.subr.mxu0 %v32_v7  ;;  %295 = vmatprep.subr.mxu1 %v124_v18  ;;  %v235_v27 = vld [vmem:[%s437_s4] ss:$0 sm:$0xff]  ;;  %s223_s10 = sshll.u32 %s327_s3, 4  ;;  %s224_s10 = int_to_ptr.vmem [resolvable:$true] %s223_s10 }
   0xf   :  { %273 = vmatpush3.msra.mxu0 %v32_v7  ;;  %296 = vmatpush3.msra.mxu1 %v124_v18  ;;  %s305_s2 = scalar_lea.vmem %s224_s10, 256  ;;  %p310_p1 = scmp.lt.s32.totalorder %s224_s10, %s224_s10 }
  0x10   :  { %274 = vmatprep.subr.mxu0 %v31_v8  ;;  %297 = vmatprep.subr.mxu1 %v123_v19  ;;  %p306_p0 = scmp.ne.s32.totalorder %s224_s10, %s305_s2  ;;  %p311_p2 = scmp.lt.s32.totalorder %s305_s2, %s305_s2 }
  0x11   :  { %275 = vmatpush3.msra.mxu0 %v31_v8  ;;  %298 = vmatpush3.msra.mxu1 %v123_v19 }
  0x12   :  { %276 = vmatprep.subr.mxu0 %v30_v9  ;;  %p312_p3 = por %p311_p2, %p310_p1 }
  0x13   :  { %277 = vmatpush3.msra.mxu0 %v30_v9 }
  0x14   :  { %278 = vmatprep.subr.mxu0 %v29_v10  ;;  %p313_p4 = pnand %p312_p3, %p306_p0 }
  0x15   :  { %279 = vmatpush3.msra.mxu0 %v29_v10 }
  0x16   :  { %280 = vmatprep.subr.mxu0 %v28_v11 }
  0x17   :  { %281 = vmatpush3.msra.mxu0 %v28_v11 }
  0x18   :  { %282 = vmatprep.subr.mxu0 %v27_v12 }
  0x19   :  { %283 = vmatpush3.msra.mxu0 %v27_v12 }
  0x1a   :  { %284 = vmatprep.subr.mxu0 %v26_v13 }
  0x1b   :  { %285 = vmatpush3.msra.mxu0 %v26_v13 }
  0x1c   :  { %286 = vmatprep.subr.mxu0 %v25_v14 }
  0x1d   :  { %287 = vmatpush3.msra.mxu0 %v25_v14 }
  0x1e   :  { %288 = vmatprep.subr.mxu0 %v24_v15 }
  0x1f   :  { %289 = vmatpush3.msra.mxu0 %v24_v15 }
  0x20   :  { %290 = vmatprep.subr.mxu0 %v23_v16 }
  0x21   :  { %291 = vmatpush3.msra.mxu0 %v23_v16 }
  0x22   :  { %293 = vmatmul.mubr.f32.vlgmr.msra.gmra.mxu0 %v22_v17 }
  0xe2   :  { %v294_v21 = vpop.f32.mrf.mxu0 }
  0xe3   :  { %v118_v22 = vadd.f32 %v294_v21, %v234_v20 }
  0xe4   :  { %v112_v23 = vpop.f32.mrf.mxu0 }
  0xe5   :  { %v113_v24 = vadd.f32 %v234_v20, %v112_v23  ;;  %v122_v26 = vmax.f32 %v118_v22, 0.0 }
  0xe7   :  { %v121_v25 = vmax.f32 %v113_v24, 0.0 }
  0xe9   :  { %299 = vmatprep.mubr.msk.f32.mxu1 %vm132_vm0, %v121_v25 }
  0xea   :  { %300 = vmatmul.mubr.msk.f32.vlgmr.msra.gmra.mxu1 %vm132_vm0, %v122_v26 }
 0x1aa   :  { %v301_v28 = vpop.f32.mrf.mxu1 }
 0x1ab   :  { %v211_v29 = vadd.f32 %v301_v28, %v235_v27 }
 0x1ac   :  { %v205_v30 = vpop.f32.mrf.mxu1 }
 0x1ad   :  { %v215_v31 = vadd.f32 %v211_v29, %v22_v17  ;;  %v206_v32 = vadd.f32 %v235_v27, %v205_v30 }
 0x1af   :  { %217 = vst [vmem:[#allocation2 + $0x8] sm:$0xff] %v215_v31  ;;  %v214_v33 = vadd.f32 %v206_v32, %v375_v4 }
 0x1b1   :  { %216 = vst [vmem:[#allocation2] sm:$0xff] %v214_v33 }
 0x1b2   :  { %316 = shalt.err (!%p313_p4)
}
 0x1b3   :  { %s328_s4 = smov 128   ;;  %s329_s11 = smov 8  }
 0x1b4   :  { %229 = dma.vmem_to_hbm [thread:$0]  %s224_s10, 256, %s438_s5, [#allocation3], %s328_s4, %s328_s4, %s329_s11  }
 0x1b5   :  { %325 = dma.done.wait [#allocation3], 256  }
 0x1b6   :  { %326 = vsyncadd [#allocation3], 4294967040 }
 0x1b7   :  { %233 = vsyncpa [#allocation3], 1 }

</bundles_post_ra>
